<compile_context>
chip_gen: v7x
topology: tpu7x:2x2x1
jax: 0.10.0
libtpu: 0.0.40
codegen_flags: <defaults>
</compile_context>

<pallas_src>
import functools

import jax
import jax.numpy as jnp
from jax.experimental import pallas as pl
from jax.experimental.pallas import tpu as pltpu

LANES = 128      # TPU lane width
MAX_TR = 4096    # max sublane rows per grid step -> (4096, 128) f32 = 2 MiB / input / buffer
NCORES = 2       # leading "parallel" grid axis (v7x has 2 TensorCores per chip)


def _diffeodd_kernel(yp_ref, s_ref, yg_ref, out_ref, acc_ref, *, n_valid, tr, spc):
    """Accumulate per-lane masked sums / counts for the 4 (y_gt, s) groups.

    acc_ref is an (8, LANES) f32 scratch:
      rows 0..3 : sum of y_pred over groups (y=1,s=0),(y=1,s=1),(y=0,s=0),(y=0,s=1)
      rows 4..7 : element counts for the same groups
    out_ref block (1, 8, LANES) is written once, at the last reduction step.
    """
    c = pl.program_id(0)   # core split (parallel)
    i = pl.program_id(1)   # row-block sweep (arbitrary / reduction)

    @pl.when(i == 0)
    def _init():
        acc_ref[...] = jnp.zeros_like(acc_ref)

    blk_elems = tr * LANES
    # Elements still valid starting at this (unclamped) block's flat offset.
    # 32-bit scalar math: fine for < 2**31 total elements.
    thr = n_valid - (c * spc + i) * blk_elems

    def accumulate(valid):
        yp = yp_ref[...].astype(jnp.float32)   # (tr, 128)
        s = s_ref[...]                         # native dtype
        yg = yg_ref[...]                       # native dtype

        y1 = yg == jnp.ones((), yg.dtype)
        y0 = yg == jnp.zeros((), yg.dtype)
        if valid is not None:
            y1 = jnp.logical_and(y1, valid)
            y0 = jnp.logical_and(y0, valid)
        s1 = s == jnp.ones((), s.dtype)
        s0 = s == jnp.zeros((), s.dtype)

        masks = (
            jnp.logical_and(y1, s0),   # (y=1, s=0)
            jnp.logical_and(y1, s1),   # (y=1, s=1)
            jnp.logical_and(y0, s0),   # (y=0, s=0)
            jnp.logical_and(y0, s1),   # (y=0, s=1)
        )

        zero_f = jnp.zeros((), jnp.float32)
        one_f = jnp.ones((), jnp.float32)

        rows = [jnp.sum(jnp.where(m, yp, zero_f), axis=0, keepdims=True) for m in masks]
        rows += [jnp.sum(jnp.where(m, one_f, zero_f), axis=0, keepdims=True) for m in masks]
        acc_ref[...] += jnp.concatenate(rows, axis=0)   # (8, LANES), single full-tile RMW

    # Fast path: whole block valid -> no iota, no flat-index math, no extra ANDs.
    @pl.when(thr >= blk_elems)
    def _full():
        accumulate(None)

    # Slow path: partially-valid block (final block / padded tail).  Fully
    # invalid (clamped duplicate) blocks fall through and do no work.
    @pl.when(jnp.logical_and(thr < blk_elems, thr > 0))
    def _partial():
        row = jax.lax.broadcasted_iota(jnp.int32, (tr, LANES), 0)
        lane = jax.lax.broadcasted_iota(jnp.int32, (tr, LANES), 1)
        valid = (row * LANES + lane) < thr
        accumulate(valid)

    @pl.when(i == pl.num_programs(1) - 1)
    def _finalize():
        out_ref[...] = acc_ref[...].reshape(1, 8, LANES)


def diffeodd(y_pred, s, y_gt):
    yp = jnp.ravel(y_pred)
    sv = jnp.ravel(s)
    yg = jnp.ravel(y_gt)

    n = yp.shape[0]

    # Minimal pad: only up to the next multiple of 128 lanes (no pad at all
    # when already aligned).  Pad values are masked in-kernel.
    rem = n % LANES
    if rem:
        pad = LANES - rem
        yp = jnp.pad(yp, (0, pad))
        sv = jnp.pad(sv, (0, pad))
        yg = jnp.pad(yg, (0, pad))
    arr_rows = yp.shape[0] // LANES

    yp2 = yp.reshape(arr_rows, LANES)
    sv2 = sv.reshape(arr_rows, LANES)
    yg2 = yg.reshape(arr_rows, LANES)

    tr = min(MAX_TR, arr_rows)          # full-dim block for small inputs
    nb = pl.cdiv(arr_rows, tr)          # number of row blocks
    spc = pl.cdiv(nb, NCORES)           # row blocks per core

    def in_map(c, i):
        # Clamp so duplicate/out-of-range blocks read a real block; their
        # contribution is skipped/zeroed by the in-kernel validity logic.
        return (jnp.minimum(c * spc + i, nb - 1), 0)

    kernel = functools.partial(_diffeodd_kernel, n_valid=n, tr=tr, spc=spc)

    partials = pl.pallas_call(
        kernel,
        out_shape=jax.ShapeDtypeStruct((NCORES, 8, LANES), jnp.float32),
        grid_spec=pltpu.PrefetchScalarGridSpec(
            num_scalar_prefetch=0,
            grid=(NCORES, spc),
            in_specs=[
                pl.BlockSpec((tr, LANES), in_map),
                pl.BlockSpec((tr, LANES), in_map),
                pl.BlockSpec((tr, LANES), in_map),
            ],
            out_specs=pl.BlockSpec((1, 8, LANES), lambda c, i: (c, 0, 0)),
            scratch_shapes=[pltpu.VMEM((8, LANES), jnp.float32)],
        ),
        compiler_params=pltpu.CompilerParams(
            # If xprof shows axis 0 is not sharded across TCs on v7x, switch
            # the first entry to pltpu.CORE_PARALLEL.
            dimension_semantics=("parallel", "arbitrary"),
            vmem_limit_bytes=32 * 1024 * 1024,
        ),
    )(yp2, sv2, yg2)

    # Tiny final reduction + divisions/abs in plain JAX.
    q = jnp.sum(partials, axis=(0, 2))          # (8,)
    # Empty group -> 0/0 -> NaN, matching torch.mean of an empty tensor.
    reg_y1 = jnp.abs(q[0] / q[4] - q[1] / q[5])
    reg_y0 = jnp.abs(q[2] / q[6] - q[3] / q[7])
    return reg_y1 + reg_y0


def _diffeodd_ref(y_pred, s, y_gt):
    yp = jnp.ravel(y_pred).astype(jnp.float32)
    sv = jnp.ravel(s).astype(jnp.float32)
    yg = jnp.ravel(y_gt).astype(jnp.float32)

    def group_mean(gy, gs):
        m = jnp.logical_and(yg == gy, sv == gs).astype(jnp.float32)
        return jnp.sum(yp * m) / jnp.sum(m)

    reg_y1 = jnp.abs(group_mean(1.0, 0.0) - group_mean(1.0, 1.0))
    reg_y0 = jnp.abs(group_mean(0.0, 0.0) - group_mean(0.0, 1.0))
    return reg_y1 + reg_y0


if __name__ == "__main__":
    key = jax.random.PRNGKey(0)
    k1, k2, k3 = jax.random.split(key, 3)
    # Shapes consistent with the module: arbitrary shape, flattened internally.
    y_pred = jax.random.uniform(k1, (2, 4, 16, 16), dtype=jnp.float32)
    s = jax.random.bernoulli(k2, 0.5, (2, 4, 16, 16)).astype(jnp.float32)
    y_gt = jax.random.bernoulli(k3, 0.5, (2, 4, 16, 16)).astype(jnp.float32)

    out = diffeodd(y_pred, s, y_gt)
    jax.block_until_ready(out)

    ref = _diffeodd_ref(y_pred, s, y_gt)
    assert jnp.allclose(out, ref, atol=1e-5, rtol=1e-5), (out, ref)
    print("KERNEL_OK")
</pallas_src>

<mosaic_0001>
module attributes {stable_mosaic.version = 11 : i64} {
  func.func @_diffeodd_kernel(%arg0: i32, %arg1: i32, %arg2: memref<16x128xf32, #tpu.memory_space<vmem>>, %arg3: memref<16x128xf32, #tpu.memory_space<vmem>>, %arg4: memref<16x128xf32, #tpu.memory_space<vmem>>, %arg5: memref<1x8x128xf32, #tpu.memory_space<vmem>>, %arg6: memref<8x128xf32, #tpu.memory_space<vmem>>) attributes {dimension_semantics = [#tpu.dimension_semantics<parallel>, #tpu.dimension_semantics<arbitrary>], iteration_bounds = array<i64: 2, 1>, scalar_prefetch = 0 : i64, scratch_operands = 1 : i64, tpu.core_type = #tpu.core_type<tc>, window_params = [{transform_indices = @transform_0, window_bounds = array<i64: 16, 128>}, {transform_indices = @transform_1, window_bounds = array<i64: 16, 128>}, {transform_indices = @transform_2, window_bounds = array<i64: 16, 128>}, {transform_indices = @transform_3, window_bounds = array<i64: 1, 8, 128>}]} {
    %c0_i32 = arith.constant 0 : i32
    %0 = arith.cmpi eq, %arg1, %c0_i32 : i32
    %1 = arith.extui %0 : i1 to i32
    %c0_i32_0 = arith.constant 0 : i32
    %2 = arith.cmpi ne, %1, %c0_i32_0 : i32
    scf.if %2 {
      %cst = arith.constant 0.000000e+00 : f32
      %18 = vector.broadcast %cst : f32 to vector<8x128xf32>
      %c0 = arith.constant 0 : index
      %c0_9 = arith.constant 0 : index
      %19 = vector.load %arg6[%c0, %c0_9] : memref<8x128xf32, #tpu.memory_space<vmem>>, vector<8x128xf32>
      tpu.vector_store %arg6[%c0, %c0_9], %18 {strides = array<i32>} : memref<8x128xf32, #tpu.memory_space<vmem>>, vector<8x128xf32>,
    } else {
    }
    %c1_i32 = arith.constant 1 : i32
    %3 = arith.muli %arg0, %c1_i32 : i32
    %4 = arith.addi %3, %arg1 : i32
    %c2048_i32 = arith.constant 2048 : i32
    %5 = arith.muli %4, %c2048_i32 : i32
    %c2048_i32_1 = arith.constant 2048 : i32
    %6 = arith.subi %c2048_i32_1, %5 : i32
    %c2048_i32_2 = arith.constant 2048 : i32
    %7 = arith.cmpi sge, %6, %c2048_i32_2 : i32
    %8 = arith.extui %7 : i1 to i32
    %c0_i32_3 = arith.constant 0 : i32
    %9 = arith.cmpi ne, %8, %c0_i32_3 : i32
    scf.if %9 {
      %c0 = arith.constant 0 : index
      %c0_9 = arith.constant 0 : index
      %18 = vector.load %arg2[%c0, %c0_9] : memref<16x128xf32, #tpu.memory_space<vmem>>, vector<16x128xf32>
      %c0_10 = arith.constant 0 : index
      %c0_11 = arith.constant 0 : index
      %19 = vector.load %arg3[%c0_10, %c0_11] : memref<16x128xf32, #tpu.memory_space<vmem>>, vector<16x128xf32>
      %c0_12 = arith.constant 0 : index
      %c0_13 = arith.constant 0 : index
      %20 = vector.load %arg4[%c0_12, %c0_13] : memref<16x128xf32, #tpu.memory_space<vmem>>, vector<16x128xf32>
      %cst = arith.constant 1.000000e+00 : f32
      %21 = vector.broadcast %cst : f32 to vector<16x128xf32>
      %22 = arith.cmpf oeq, %20, %21 : vector<16x128xf32>
      %cst_14 = arith.constant 0.000000e+00 : f32
      %23 = vector.broadcast %cst_14 : f32 to vector<16x128xf32>
      %24 = arith.cmpf oeq, %20, %23 : vector<16x128xf32>
      %cst_15 = arith.constant 1.000000e+00 : f32
      %25 = vector.broadcast %cst_15 : f32 to vector<16x128xf32>
      %26 = arith.cmpf oeq, %19, %25 : vector<16x128xf32>
      %cst_16 = arith.constant 0.000000e+00 : f32
      %27 = vector.broadcast %cst_16 : f32 to vector<16x128xf32>
      %28 = arith.cmpf oeq, %19, %27 : vector<16x128xf32>
      %29 = arith.andi %22, %28 : vector<16x128xi1>
      %30 = arith.andi %22, %26 : vector<16x128xi1>
      %31 = arith.andi %24, %28 : vector<16x128xi1>
      %32 = arith.andi %24, %26 : vector<16x128xi1>
      %cst_17 = arith.constant 0.000000e+00 : f32
      %33 = vector.broadcast %cst_17 : f32 to vector<16x128xf32>
      %34 = arith.select %29, %18, %33 : vector<16x128xi1>, vector<16x128xf32>
      %cst_18 = arith.constant dense<0.000000e+00> : vector<128xf32>
      %35 = vector.multi_reduction <add>, %34, %cst_18 [0] : vector<16x128xf32> to vector<128xf32>
      %36 = vector.shape_cast %35 : vector<128xf32> to vector<1x128xf32>
      %cst_19 = arith.constant 0.000000e+00 : f32
      %37 = vector.broadcast %cst_19 : f32 to vector<16x128xf32>
      %38 = arith.select %30, %18, %37 : vector<16x128xi1>, vector<16x128xf32>
      %cst_20 = arith.constant dense<0.000000e+00> : vector<128xf32>
      %39 = vector.multi_reduction <add>, %38, %cst_20 [0] : vector<16x128xf32> to vector<128xf32>
      %40 = vector.shape_cast %39 : vector<128xf32> to vector<1x128xf32>
      %cst_21 = arith.constant 0.000000e+00 : f32
      %41 = vector.broadcast %cst_21 : f32 to vector<16x128xf32>
      %42 = arith.select %31, %18, %41 : vector<16x128xi1>, vector<16x128xf32>
      %cst_22 = arith.constant dense<0.000000e+00> : vector<128xf32>
      %43 = vector.multi_reduction <add>, %42, %cst_22 [0] : vector<16x128xf32> to vector<128xf32>
      %44 = vector.shape_cast %43 : vector<128xf32> to vector<1x128xf32>
      %cst_23 = arith.constant 0.000000e+00 : f32
      %45 = vector.broadcast %cst_23 : f32 to vector<16x128xf32>
      %46 = arith.select %32, %18, %45 : vector<16x128xi1>, vector<16x128xf32>
      %cst_24 = arith.constant dense<0.000000e+00> : vector<128xf32>
      %47 = vector.multi_reduction <add>, %46, %cst_24 [0] : vector<16x128xf32> to vector<128xf32>
      %48 = vector.shape_cast %47 : vector<128xf32> to vector<1x128xf32>
      %cst_25 = arith.constant 1.000000e+00 : f32
      %cst_26 = arith.constant 0.000000e+00 : f32
      %49 = vector.broadcast %cst_25 : f32 to vector<16x128xf32>
      %50 = vector.broadcast %cst_26 : f32 to vector<16x128xf32>
      %51 = arith.select %29, %49, %50 : vector<16x128xi1>, vector<16x128xf32>
      %cst_27 = arith.constant dense<0.000000e+00> : vector<128xf32>
      %52 = vector.multi_reduction <add>, %51, %cst_27 [0] : vector<16x128xf32> to vector<128xf32>
      %53 = vector.shape_cast %52 : vector<128xf32> to vector<1x128xf32>
      %cst_28 = arith.constant 1.000000e+00 : f32
      %cst_29 = arith.constant 0.000000e+00 : f32
      %54 = vector.broadcast %cst_28 : f32 to vector<16x128xf32>
      %55 = vector.broadcast %cst_29 : f32 to vector<16x128xf32>
      %56 = arith.select %30, %54, %55 : vector<16x128xi1>, vector<16x128xf32>
      %cst_30 = arith.constant dense<0.000000e+00> : vector<128xf32>
      %57 = vector.multi_reduction <add>, %56, %cst_30 [0] : vector<16x128xf32> to vector<128xf32>
      %58 = vector.shape_cast %57 : vector<128xf32> to vector<1x128xf32>
      %cst_31 = arith.constant 1.000000e+00 : f32
      %cst_32 = arith.constant 0.000000e+00 : f32
      %59 = vector.broadcast %cst_31 : f32 to vector<16x128xf32>
      %60 = vector.broadcast %cst_32 : f32 to vector<16x128xf32>
      %61 = arith.select %31, %59, %60 : vector<16x128xi1>, vector<16x128xf32>
      %cst_33 = arith.constant dense<0.000000e+00> : vector<128xf32>
      %62 = vector.multi_reduction <add>, %61, %cst_33 [0] : vector<16x128xf32> to vector<128xf32>
      %63 = vector.shape_cast %62 : vector<128xf32> to vector<1x128xf32>
      %cst_34 = arith.constant 1.000000e+00 : f32
      %cst_35 = arith.constant 0.000000e+00 : f32
      %64 = vector.broadcast %cst_34 : f32 to vector<16x128xf32>
      %65 = vector.broadcast %cst_35 : f32 to vector<16x128xf32>
      %66 = arith.select %32, %64, %65 : vector<16x128xi1>, vector<16x128xf32>
      %cst_36 = arith.constant dense<0.000000e+00> : vector<128xf32>
      %67 = vector.multi_reduction <add>, %66, %cst_36 [0] : vector<16x128xf32> to vector<128xf32>
      %68 = vector.shape_cast %67 : vector<128xf32> to vector<1x128xf32>
      %c0_37 = arith.constant 0 : index
      %c0_38 = arith.constant 0 : index
      %69 = vector.load %arg6[%c0_37, %c0_38] : memref<8x128xf32, #tpu.memory_space<vmem>>, vector<8x128xf32>
      %70 = tpu.concatenate %36, %40, %44, %48, %53, %58, %63, %68 in 0 : vector<1x128xf32>, vector<1x128xf32>, vector<1x128xf32>, vector<1x128xf32>, vector<1x128xf32>, vector<1x128xf32>, vector<1x128xf32>, vector<1x128xf32> -> vector<8x128xf32>
      %71 = arith.addf %69, %70 : vector<8x128xf32>
      %c0_39 = arith.constant 0 : index
      %c0_40 = arith.constant 0 : index
      %72 = vector.load %arg6[%c0_39, %c0_40] : memref<8x128xf32, #tpu.memory_space<vmem>>, vector<8x128xf32>
      tpu.vector_store %arg6[%c0_39, %c0_40], %71 {strides = array<i32>} : memref<8x128xf32, #tpu.memory_space<vmem>>, vector<8x128xf32>,
    } else {
    }
    %c2048_i32_4 = arith.constant 2048 : i32
    %10 = arith.cmpi slt, %6, %c2048_i32_4 : i32
    %c0_i32_5 = arith.constant 0 : i32
    %11 = arith.cmpi sgt, %6, %c0_i32_5 : i32
    %12 = arith.andi %10, %11 : i1
    %13 = arith.extui %12 : i1 to i32
    %c0_i32_6 = arith.constant 0 : i32
    %14 = arith.cmpi ne, %13, %c0_i32_6 : i32
    scf.if %14 {
      %18 = tpu.iota {dimensions = array<i32: 0>} : vector<16x128xi32>
      %19 = tpu.iota {dimensions = array<i32: 1>} : vector<16x128xi32>
      %c128_i32 = arith.constant 128 : i32
      %20 = vector.broadcast %c128_i32 : i32 to vector<16x128xi32>
      %21 = arith.muli %18, %20 : vector<16x128xi32>
      %22 = arith.addi %21, %19 : vector<16x128xi32>
      %23 = vector.broadcast %6 : i32 to vector<16x128xi32>
      %24 = arith.cmpi slt, %22, %23 : vector<16x128xi32>
      %c0 = arith.constant 0 : index
      %c0_9 = arith.constant 0 : index
      %25 = vector.load %arg2[%c0, %c0_9] : memref<16x128xf32, #tpu.memory_space<vmem>>, vector<16x128xf32>
      %c0_10 = arith.constant 0 : index
      %c0_11 = arith.constant 0 : index
      %26 = vector.load %arg3[%c0_10, %c0_11] : memref<16x128xf32, #tpu.memory_space<vmem>>, vector<16x128xf32>
      %c0_12 = arith.constant 0 : index
      %c0_13 = arith.constant 0 : index
      %27 = vector.load %arg4[%c0_12, %c0_13] : memref<16x128xf32, #tpu.memory_space<vmem>>, vector<16x128xf32>
      %cst = arith.constant 1.000000e+00 : f32
      %28 = vector.broadcast %cst : f32 to vector<16x128xf32>
      %29 = arith.cmpf oeq, %27, %28 : vector<16x128xf32>
      %cst_14 = arith.constant 0.000000e+00 : f32
      %30 = vector.broadcast %cst_14 : f32 to vector<16x128xf32>
      %31 = arith.cmpf oeq, %27, %30 : vector<16x128xf32>
      %32 = arith.andi %29, %24 : vector<16x128xi1>
      %33 = arith.andi %31, %24 : vector<16x128xi1>
      %cst_15 = arith.constant 1.000000e+00 : f32
      %34 = vector.broadcast %cst_15 : f32 to vector<16x128xf32>
      %35 = arith.cmpf oeq, %26, %34 : vector<16x128xf32>
      %cst_16 = arith.constant 0.000000e+00 : f32
      %36 = vector.broadcast %cst_16 : f32 to vector<16x128xf32>
      %37 = arith.cmpf oeq, %26, %36 : vector<16x128xf32>
      %38 = arith.andi %32, %37 : vector<16x128xi1>
      %39 = arith.andi %32, %35 : vector<16x128xi1>
      %40 = arith.andi %33, %37 : vector<16x128xi1>
      %41 = arith.andi %33, %35 : vector<16x128xi1>
      %cst_17 = arith.constant 0.000000e+00 : f32
      %42 = vector.broadcast %cst_17 : f32 to vector<16x128xf32>
      %43 = arith.select %38, %25, %42 : vector<16x128xi1>, vector<16x128xf32>
      %cst_18 = arith.constant dense<0.000000e+00> : vector<128xf32>
      %44 = vector.multi_reduction <add>, %43, %cst_18 [0] : vector<16x128xf32> to vector<128xf32>
      %45 = vector.shape_cast %44 : vector<128xf32> to vector<1x128xf32>
      %cst_19 = arith.constant 0.000000e+00 : f32
      %46 = vector.broadcast %cst_19 : f32 to vector<16x128xf32>
      %47 = arith.select %39, %25, %46 : vector<16x128xi1>, vector<16x128xf32>
      %cst_20 = arith.constant dense<0.000000e+00> : vector<128xf32>
      %48 = vector.multi_reduction <add>, %47, %cst_20 [0] : vector<16x128xf32> to vector<128xf32>
      %49 = vector.shape_cast %48 : vector<128xf32> to vector<1x128xf32>
      %cst_21 = arith.constant 0.000000e+00 : f32
      %50 = vector.broadcast %cst_21 : f32 to vector<16x128xf32>
      %51 = arith.select %40, %25, %50 : vector<16x128xi1>, vector<16x128xf32>
      %cst_22 = arith.constant dense<0.000000e+00> : vector<128xf32>
      %52 = vector.multi_reduction <add>, %51, %cst_22 [0] : vector<16x128xf32> to vector<128xf32>
      %53 = vector.shape_cast %52 : vector<128xf32> to vector<1x128xf32>
      %cst_23 = arith.constant 0.000000e+00 : f32
      %54 = vector.broadcast %cst_23 : f32 to vector<16x128xf32>
      %55 = arith.select %41, %25, %54 : vector<16x128xi1>, vector<16x128xf32>
      %cst_24 = arith.constant dense<0.000000e+00> : vector<128xf32>
      %56 = vector.multi_reduction <add>, %55, %cst_24 [0] : vector<16x128xf32> to vector<128xf32>
      %57 = vector.shape_cast %56 : vector<128xf32> to vector<1x128xf32>
      %cst_25 = arith.constant 1.000000e+00 : f32
      %cst_26 = arith.constant 0.000000e+00 : f32
      %58 = vector.broadcast %cst_25 : f32 to vector<16x128xf32>
      %59 = vector.broadcast %cst_26 : f32 to vector<16x128xf32>
      %60 = arith.select %38, %58, %59 : vector<16x128xi1>, vector<16x128xf32>
      %cst_27 = arith.constant dense<0.000000e+00> : vector<128xf32>
      %61 = vector.multi_reduction <add>, %60, %cst_27 [0] : vector<16x128xf32> to vector<128xf32>
      %62 = vector.shape_cast %61 : vector<128xf32> to vector<1x128xf32>
      %cst_28 = arith.constant 1.000000e+00 : f32
      %cst_29 = arith.constant 0.000000e+00 : f32
      %63 = vector.broadcast %cst_28 : f32 to vector<16x128xf32>
      %64 = vector.broadcast %cst_29 : f32 to vector<16x128xf32>
      %65 = arith.select %39, %63, %64 : vector<16x128xi1>, vector<16x128xf32>
      %cst_30 = arith.constant dense<0.000000e+00> : vector<128xf32>
      %66 = vector.multi_reduction <add>, %65, %cst_30 [0] : vector<16x128xf32> to vector<128xf32>
      %67 = vector.shape_cast %66 : vector<128xf32> to vector<1x128xf32>
      %cst_31 = arith.constant 1.000000e+00 : f32
      %cst_32 = arith.constant 0.000000e+00 : f32
      %68 = vector.broadcast %cst_31 : f32 to vector<16x128xf32>
      %69 = vector.broadcast %cst_32 : f32 to vector<16x128xf32>
      %70 = arith.select %40, %68, %69 : vector<16x128xi1>, vector<16x128xf32>
      %cst_33 = arith.constant dense<0.000000e+00> : vector<128xf32>
      %71 = vector.multi_reduction <add>, %70, %cst_33 [0] : vector<16x128xf32> to vector<128xf32>
      %72 = vector.shape_cast %71 : vector<128xf32> to vector<1x128xf32>
      %cst_34 = arith.constant 1.000000e+00 : f32
      %cst_35 = arith.constant 0.000000e+00 : f32
      %73 = vector.broadcast %cst_34 : f32 to vector<16x128xf32>
      %74 = vector.broadcast %cst_35 : f32 to vector<16x128xf32>
      %75 = arith.select %41, %73, %74 : vector<16x128xi1>, vector<16x128xf32>
      %cst_36 = arith.constant dense<0.000000e+00> : vector<128xf32>
      %76 = vector.multi_reduction <add>, %75, %cst_36 [0] : vector<16x128xf32> to vector<128xf32>
      %77 = vector.shape_cast %76 : vector<128xf32> to vector<1x128xf32>
      %c0_37 = arith.constant 0 : index
      %c0_38 = arith.constant 0 : index
      %78 = vector.load %arg6[%c0_37, %c0_38] : memref<8x128xf32, #tpu.memory_space<vmem>>, vector<8x128xf32>
      %79 = tpu.concatenate %45, %49, %53, %57, %62, %67, %72, %77 in 0 : vector<1x128xf32>, vector<1x128xf32>, vector<1x128xf32>, vector<1x128xf32>, vector<1x128xf32>, vector<1x128xf32>, vector<1x128xf32>, vector<1x128xf32> -> vector<8x128xf32>
      %80 = arith.addf %78, %79 : vector<8x128xf32>
      %c0_39 = arith.constant 0 : index
      %c0_40 = arith.constant 0 : index
      %81 = vector.load %arg6[%c0_39, %c0_40] : memref<8x128xf32, #tpu.memory_space<vmem>>, vector<8x128xf32>
      tpu.vector_store %arg6[%c0_39, %c0_40], %80 {strides = array<i32>} : memref<8x128xf32, #tpu.memory_space<vmem>>, vector<8x128xf32>,
    } else {
    }
    %c0_i32_7 = arith.constant 0 : i32
    %15 = arith.cmpi eq, %arg1, %c0_i32_7 : i32
    %16 = arith.extui %15 : i1 to i32
    %c0_i32_8 = arith.constant 0 : i32
    %17 = arith.cmpi ne, %16, %c0_i32_8 : i32
    scf.if %17 {
      %c0 = arith.constant 0 : index
      %c0_9 = arith.constant 0 : index
      %18 = vector.load %arg6[%c0, %c0_9] : memref<8x128xf32, #tpu.memory_space<vmem>>, vector<8x128xf32>
      %19 = vector.shape_cast %18 : vector<8x128xf32> to vector<1x8x128xf32>
      %c0_10 = arith.constant 0 : index
      %c0_11 = arith.constant 0 : index
      %c0_12 = arith.constant 0 : index
      %20 = vector.load %arg5[%c0_10, %c0_11, %c0_12] : memref<1x8x128xf32, #tpu.memory_space<vmem>>, vector<1x8x128xf32>
      tpu.vector_store %arg5[%c0_10, %c0_11, %c0_12], %19 {strides = array<i32>} : memref<1x8x128xf32, #tpu.memory_space<vmem>>, vector<1x8x128xf32>,
    } else {
    }
    return
  }
  func.func @transform_0(%arg0: i32, %arg1: i32) -> (i32, i32) {
    %c1_i32 = arith.constant 1 : i32
    %0 = arith.muli %arg0, %c1_i32 : i32
    %1 = arith.addi %0, %arg1 : i32
    %c0_i32 = arith.constant 0 : i32
    %2 = arith.minsi %1, %c0_i32 : i32
    %c0_i32_0 = arith.constant 0 : i32
    %c0_i32_1 = arith.constant 0 : i32
    return %2, %c0_i32_0 : i32, i32
  }
  func.func @transform_1(%arg0: i32, %arg1: i32) -> (i32, i32) {
    %c1_i32 = arith.constant 1 : i32
    %0 = arith.muli %arg0, %c1_i32 : i32
    %1 = arith.addi %0, %arg1 : i32
    %c0_i32 = arith.constant 0 : i32
    %2 = arith.minsi %1, %c0_i32 : i32
    %c0_i32_0 = arith.constant 0 : i32
    %c0_i32_1 = arith.constant 0 : i32
    return %2, %c0_i32_0 : i32, i32
  }
  func.func @transform_2(%arg0: i32, %arg1: i32) -> (i32, i32) {
    %c1_i32 = arith.constant 1 : i32
    %0 = arith.muli %arg0, %c1_i32 : i32
    %1 = arith.addi %0, %arg1 : i32
    %c0_i32 = arith.constant 0 : i32
    %2 = arith.minsi %1, %c0_i32 : i32
    %c0_i32_0 = arith.constant 0 : i32
    %c0_i32_1 = arith.constant 0 : i32
    return %2, %c0_i32_0 : i32, i32
  }
  func.func @transform_3(%arg0: i32, %arg1: i32) -> (i32, i32, i32) {
    %c0_i32 = arith.constant 0 : i32
    %c0_i32_0 = arith.constant 0 : i32
    %c0_i32_1 = arith.constant 0 : i32
    return %arg0, %c0_i32, %c0_i32_0 : i32, i32, i32
  }
}

</mosaic_0001>

<bundles_post_ra>
// kernel: tpu_custom_call.1
= control target key start
LH: loop header
LB: loop body
LE: loop exit
PB: predicated region body
PF: predicated region fallthrough
CT: control target
= control target key end

     0   :  { %s1438_s0 = inlined_call_operand.hbm [shape: f32[16,128], index: 0, kind: input, shape index: {}]   ;;  %s1439_s1 = inlined_call_operand.hbm [shape: f32[16,128], index: 1, kind: input, shape index: {}]   ;;  %s1440_s2 = inlined_call_operand.hbm [shape: f32[16,128], index: 2, kind: input, shape index: {}]   ;;  %s1441_s3 = inlined_call_operand.hbm [shape: f32[2,8,128], index: 3, kind: output, shape index: {}]  }
   0x1   :  { %1448 = sst [smem:[#allocation16_spill]] %s1439_s1 }
   0x2   :  { %8 = vsyncpa [#allocation4], 0 }
   0x3   :  { %10 = vsyncpa [#allocation4 + $0x1], 0 }
   0x4   :  { %11 = vsyncpa [#allocation7], 0 }
   0x5   :  { %13 = vsyncpa [#allocation7 + $0x1], 0 }
   0x6   :  { %14 = vsyncpa [#allocation5], 0 }
   0x7   :  { %16 = vsyncpa [#allocation5 + $0x1], 0  ;;  %s1069_s12 = smov 0   ;;  %s1071_s13 = smov 0  }
   0x8   :  { %s1073_s14 = smov 0   ;;  %s1075_s15 = smov 0  }
   0x9   :  { %s1077_s16 = smov 0   ;;  %s1079_s17 = smov 0  }
   0xa   :  { %s1081_s18 = smov 0   ;;  %s1083_s19 = smov 0  }
   0xb LB: > { %1449 = sst [smem:[#allocation13_spill]] %s1034_s18  ;;  %s1108_s20 = sadd.s32 4294967295, %s1038_s19   ;;  %s1038_s19 = sphi %s1083_s19, %s22_s19   ;;  %s1034_s18 = sphi %s1081_s18, %s1488_s18   ;;  %s1030_s17 = sphi %s1079_s17, %s1487_s17   ;;  %s1026_s16 = sphi %s1077_s16, %s1428_s16   ;;  %s1022_s15 = sphi %s1075_s15, %s1492_s15   ;;  %s1018_s14 = sphi %s1073_s14, %s1491_s14   ;;  %s1014_s13 = sphi %s1071_s13, %s1490_s13   ;;  %s1010_s12 = sphi %s1069_s12, %s1489_s12  }
   0xc   : > { %s714_s21 = sadd.s32 4294967294, %s1038_s19   ;;  %s34_s22 = sadd.s32 1, %s1034_s18 }
   0xd   : > { %p36_p0 = scmp.ge.s32.totalorder %s34_s22, 2  ;;  %p1007_p1 = scmp.ne.s32.totalorder %s1026_s16, 0 }
   0xe   : > { %p55_p2 = scmp.eq.s32.totalorder %s1038_s19, 0  ;;  %p60_p3 = scmp.ne.s32.totalorder %s1026_s16, %s1022_s15 }
   0xf   : > { %s1494_s22 = smov (%p36_p0, %s34_s22), 0  ;;  %p61_p5 = scmp.eq.s32.totalorder %s1108_s20, 0 }
  0x10   : > { %1450 = sst [smem:[#allocation14_spill]] %s1494_s22  ;;  %p1117_p4 = por %p1007_p1, %p55_p2 }
  0x11   : > { %p1122_p6 = por %p61_p5, %p60_p3  ;;  %s134_s25 = ssub.s32 %s1034_s18, %s1494_s22 }
  0x12   : > { %p135_p7 = scmp.eq.s32.totalorder %s134_s25, 0  ;;  %s137_s26 = sadd.s32 1, %s1018_s14 }
  0x13   : > { %s1452_s24 = scalar_select %p1122_p6, 1, 0 }
  0x14   : > { %s1130_s27 = scalar_select %p135_p7, %s1018_s14, %s137_s26  }
  0x15   : > { %p147_p8 = scmp.ne.s32.totalorder %s1018_s14, %s1014_s13  ;;  %p148_p9 = scmp.eq.s32.totalorder %s1108_s20, 1 }
  0x16   : > { %1453 = sst [smem:[#allocation15_spill]] %s1130_s27  ;;  %p153_p10 = scmp.ne.s32.totalorder %s1014_s13, %s1010_s12 }
  0x17   : > { %p154_p11 = scmp.eq.s32.totalorder %s714_s21, 1  ;;  %p1137_p12 = por %p148_p9, %p147_p8 }
  0x18   : > { %p762_p1 = scmp.lt.s32.totalorder %s1038_s19, 2  ;;  %s198_s4 = sand.u32 1, %s1038_s19  }
  0x19   : > { %s1454_s28 = scalar_select %p1137_p12, 1, 0 }
  0x1a   : > { %p1142_p0 = por %p154_p11, %p153_p10  ;;  %p1149_p2 = pnand %p762_p1, %p1117_p4 }
  0x1b   : > { %s1040_s5 = smov [#allocation6]   ;;  %s1157_s7 = scalar_lea.sflag [#allocation7], %s198_s4 }
  0x1c   : > { %s1455_s29 = scalar_select %p1142_p0, 1, 0 }
  0x1d   : > { %s1456_s30 = scalar_select %p1149_p2, 1, 0 }
  0x1e   : > { %s212_s6 = sshll.u32 %s1040_s5, 4  ;;  %s1457_s1 = sld [smem:[#allocation16_spill]]  ;;  %s1154_s6 = int_to_ptr.vmem [resolvable:$true] %s212_s6 }
  0x1f   : > { %p1167_p5 = pneg %p1149_p2 }
  0x24   : > { %s841_s10 = scalar_lea.hbm %s1457_s1, 256 }
  0x25   : > { %p842_p4 = scmp.ne.s32.totalorder %s1457_s1, %s841_s10  ;;  %p848_p9 = scmp.lt.u32.totalorder %s841_s10, %s841_s10 }
  0x26   : > { %p850_p10 = scmp.lt.u32.totalorder %s841_s10, %s1457_s1 }
  0x27   : > { %p844_p7 = pnand %p1167_p5, %p842_p4 }
  0x28   : > { %p851_p11 = por %p850_p10, %p848_p9 }
  0x29   : > { %p845_p8 = pneg %p844_p7 }
  0x2b   : > { %p852_p1 = pnand %p851_p11, %p845_p8 }
  0x2d   : > { %855 = shalt.err (!%p852_p1)
}
  0x2e   : > { %s856_s26 = scalar_lea.vmem %s1154_s6, 256  ;;  %s863_s4 = scalar_lea.vmem %s1154_s6, 512 }
  0x2f   : > { %p857_p13 = scmp.ne.s32.totalorder %s1154_s6, %s856_s26  ;;  %p864_p4 = scmp.lt.s32.totalorder %s1154_s6, %s1154_s6 }
  0x30   : > { %p865_p7 = scmp.lt.s32.totalorder %s863_s4, %s856_s26 }
  0x31   : > { %p859_p3 = pnand %p857_p13, %p1167_p5 }
  0x32   : > { %p866_p12 = por %p865_p7, %p864_p4 }
  0x33   : > { %p860_p0 = pneg %p859_p3 }
  0x35   : > { %p867_p6 = pnand %p866_p12, %p860_p0 }
  0x37   : > { %870 = shalt.err (!%p867_p6)
}
  0x38   : > { %s1041_s5 = smov 128   ;;  %s1042_s8 = smov 8  }
  0x39   : > { %754 = dma.hbm_to_vmem [thread:$0]  (!%p1149_p2), %s1457_s1, 256, %s1154_s6, %s1157_s7, %s1041_s5, %s1041_s5, %s1042_s8  }
  0x3a   : > { %p244_p13 = scmp.lt.s32.totalorder %s1038_s19, 3  ;;  %p1459_p3 = scmp.ge.s32.totalorder %s1038_s19, 1 }
  0x3b   : > { %s1043_s15 = smov [#allocation3]   ;;  %s871_s4 = scalar_lea.hbm %s1438_s0, 256 }
  0x3c   : > { %p1196_p12 = pnand %p1459_p3, %p244_p13  ;;  %s188_s23 = sshll.u32 %s1043_s15, 4  ;;  %s189_s23 = int_to_ptr.vmem [resolvable:$true] %s188_s23 }
  0x3d   : > { %p872_p6 = scmp.ne.s32.totalorder %s1438_s0, %s871_s4  ;;  %p878_p9 = scmp.lt.u32.totalorder %s871_s4, %s871_s4 }
  0x3e   : > { %s1460_s11 = scalar_select %p1196_p12, 1, 0 }
  0x3f   : > { %p874_p0 = pnand %p872_p6, %p1167_p5  ;;  %p880_p10 = scmp.lt.u32.totalorder %s871_s4, %s1438_s0 }
  0x41   : > { %p875_p8 = pneg %p874_p0  ;;  %p881_p11 = por %p880_p10, %p878_p9 }
  0x43   : > { %p882_p1 = pnand %p881_p11, %p875_p8 }
  0x45   : > { %885 = shalt.err (!%p882_p1)
}
  0x46   : > { %s886_s10 = scalar_lea.vmem %s189_s23, 256  ;;  %s893_s15 = scalar_lea.vmem %s189_s23, 512 }
  0x47   : > { %p887_p4 = scmp.ne.s32.totalorder %s189_s23, %s886_s10  ;;  %p894_p3 = scmp.lt.s32.totalorder %s189_s23, %s189_s23 }
  0x48   : > { %p895_p12 = scmp.lt.s32.totalorder %s893_s15, %s886_s10 }
  0x49   : > { %p889_p7 = pnand %p887_p4, %p1167_p5 }
  0x4a   : > { %p896_p2 = por %p895_p12, %p894_p3 }
  0x4b   : > { %p890_p13 = pneg %p889_p7 }
  0x4d   : > { %p897_p6 = pnand %p896_p2, %p890_p13 }
  0x4f   : > { %900 = shalt.err (!%p897_p6)
}
  0x50   : > { %p1461_p0 = scmp.ne.s32.totalorder %s1456_s30, 0  ;;  %s1044_s25 = smov [#allocation8]  }
  0x51   : > { %s236_s26 = sshll.u32 %s1044_s25, 4  ;;  %s901_s9 = scalar_lea.hbm %s1440_s2, 256  ;;  %s237_s26 = int_to_ptr.vmem [resolvable:$true] %s236_s26 }
  0x52   : > { %751 = dma.hbm_to_vmem [thread:$0]  (!%p1461_p0), %s1438_s0, 256, %s189_s23, [#allocation4], %s1041_s5, %s1041_s5, %s1042_s8  }
  0x53   : > { %p902_p2 = scmp.ne.s32.totalorder %s1440_s2, %s901_s9  ;;  %p908_p9 = scmp.lt.u32.totalorder %s901_s9, %s901_s9 }
  0x54   : > { %p910_p10 = scmp.lt.u32.totalorder %s901_s9, %s1440_s2 }
  0x55   : > { %p904_p12 = pnand %p902_p2, %p1167_p5 }
  0x56   : > { %p911_p11 = por %p910_p10, %p908_p9 }
  0x57   : > { %p905_p8 = pneg %p904_p12 }
  0x59   : > { %p912_p1 = pnand %p911_p11, %p905_p8 }
  0x5b   : > { %915 = shalt.err (!%p912_p1)
}
  0x5c   : > { %s916_s23 = scalar_lea.vmem %s237_s26, 256  ;;  %s923_s18 = scalar_lea.vmem %s237_s26, 512 }
  0x5d   : > { %p917_p4 = scmp.ne.s32.totalorder %s237_s26, %s916_s23  ;;  %p924_p3 = scmp.lt.s32.totalorder %s237_s26, %s237_s26 }
  0x5e   : > { %p925_p6 = scmp.lt.s32.totalorder %s923_s18, %s916_s23 }
  0x5f   : > { %p919_p7 = pnand %p917_p4, %p1167_p5 }
  0x60   : > { %p926_p0 = por %p925_p6, %p924_p3 }
  0x61   : > { %p920_p13 = pneg %p919_p7 }
  0x63   : > { %p927_p2 = pnand %p926_p0, %p920_p13 }
  0x65   : > { %930 = shalt.err (!%p927_p2)
}
  0x66   : > { %p1462_p12 = scmp.ne.s32.totalorder %s1456_s30, 0  ;;  %p1463_p8 = scmp.ne.s32.totalorder %s1460_s11, 0 }
  0x67   : > { %s250_s21 = sand.u32 (!%p1463_p8), 1, %s1026_s16   ;;  %p1464_p5 = scmp.ne.s32.totalorder (!%p1463_p8), %s1452_s24, 0 }
  0x68   : > { %757 = dma.hbm_to_vmem [thread:$0]  (!%p1462_p12), %s1440_s2, 256, %s237_s26, %s1157_s7, %s1041_s5, %s1041_s5, %s1042_s8  }
  0x69   : > { %248 = sbr.rel (%p1463_p8) target bundleno = 228 (0xe4), region = 32  ;;  %s727_s22 = sshll.u32 (!%p1463_p8), %s250_s21, 4 }
  0x6a   : > { %s251_s25 = scalar_lea.sflag (!%p1463_p8), [#allocation4], %s250_s21  ;;  %s1246_s4 = scalar_lea.vmem (!%p1463_p8), [#allocation3], %s727_s22 }
  0x70   : > { %996 = dma.done.wait (%p1464_p5), %s251_s25, 256  }
  0x71   : > { %998 = vsyncadd (%p1464_p5), %s251_s25, 4294967040  ;;  %s259_s30 = sand.u32 1, %s1108_s20   ;;  %s1253_s7 = scalar_lea.vmem [#allocation6], %s727_s22 }
  0x72   : > { %s260_s6 = scalar_lea.sflag [#allocation7], %s259_s30 }
  0x73   : > { %1000 = dma.done.wait (%p1464_p5), %s260_s6, 512  }
  0x74   : > { %1002 = vsyncadd (%p1464_p5), %s260_s6, 4294966784  ;;  %s302_s5 = sand.u32 1, %s1014_s13   ;;  %v1045_v0 = vmov 0.0   ;;  %s731_s11 = sshll.u32 %s1030_s17, 11 }
  0x75   : > { %s1262_s8 = sshll.u32 %s302_s5, 3  ;;  %321 = vst [vmem:[#allocation2] sm:$0xff] %v1045_v0  ;;  %s1265_s20 = ssub.s32 2048, %s731_s11 }
  0x76   : > { %s1267_s26 = scalar_lea.vmem [#allocation8], %s727_s22  ;;  %s304_s9 = scalar_lea.vmem [#allocation9], %s1262_s8 }
  0x77   : > { %p732_p0 = scmp.lt.s32.totalorder %s1265_s20, 2048 }
  0x78   : > { %v329_v1 = vld [vmem:[%s1246_s4] sm:$0xff] (!%p732_p0)  ;;  %v332_v3 = vld [vmem:[%s1253_s7 + $0x8] sm:$0xff] (!%p732_p0)  ;;  %v1046_v8 = vmov (!%p732_p0), 0.0  }
  0x79   : > { %328 = sbr.rel (%p732_p0) target bundleno = 155 (0x9b), region = 52  ;;  %v331_v2 = vld [vmem:[%s1253_s7] sm:$0xff] (!%p732_p0)  ;;  %v334_v5 = vld [vmem:[%s1267_s26 + $0x8] sm:$0xff] (!%p732_p0)  ;;  %vm340_vm4 = vcmp.eq.f32.partialorder (!%p732_p0), %v332_v3, 1.0  ;;  %vm342_vm5 = vcmp.eq.f32.partialorder (!%p732_p0), %v332_v3, 0.0 }
  0x7a   : > { %v333_v4 = vld [vmem:[%s1267_s26] sm:$0xff] (!%p732_p0)  ;;  %vm341_vm0 = vcmp.eq.f32.partialorder (!%p732_p0), %v331_v2, 0.0  ;;  %v330_v6 = vld [vmem:[%s1246_s4 + $0x8] sm:$0xff] (!%p732_p0)  ;;  %vm336_vm2 = vcmp.eq.f32.partialorder (!%p732_p0), %v334_v5, 1.0  ;;  %vm339_vm3 = vcmp.eq.f32.partialorder (!%p732_p0), %v331_v2, 1.0  ;;  %vm338_vm9 = vcmp.eq.f32.partialorder (!%p732_p0), %v334_v5, 0.0 }
  0x7b   : > { %vm335_vm1 = vcmp.eq.f32.partialorder (!%p732_p0), %v333_v4, 1.0  ;;  %vm337_vm7 = vcmp.eq.f32.partialorder (!%p732_p0), %v333_v4, 0.0  ;;  %vm344_vm8 = vmand (!%p732_p0), %vm336_vm2, %vm342_vm5 }
  0x7c   : > { %vm343_vm6 = vmand (!%p732_p0), %vm335_vm1, %vm341_vm0  ;;  %v352_v10 = vsel (!%p732_p0), %vm344_vm8, %v330_v6, 0.0  ;;  %v388_v11 = vsel (!%p732_p0), %vm344_vm8, 1.0, %v1046_v8 }
  0x7d   : > { %v351_v7 = vsel (!%p732_p0), %vm343_vm6, %v329_v1, 0.0  ;;  %v387_v9 = vsel (!%p732_p0), %vm343_vm6, 1.0, %v1046_v8  ;;  %vm345_vm10 = vmand (!%p732_p0), %vm335_vm1, %vm339_vm3  ;;  %vm426_vm1 = vcmask (!%p732_p0), 1041408   ;;  %vm436_vm6 = vcmask (!%p732_p0), 1046528  }
  0x7e   : > { %vm346_vm11 = vmand (!%p732_p0), %vm336_vm2, %vm340_vm4  ;;  %v353_v12 = vadd.f32 (!%p732_p0), %v352_v10, %v351_v7  ;;  %v360_v13 = vsel (!%p732_p0), %vm345_vm10, %v329_v1, 0.0  ;;  %v389_v14 = vadd.f32 (!%p732_p0), %v388_v11, %v387_v9  ;;  %v396_v15 = vsel (!%p732_p0), %vm345_vm10, 1.0, %v1046_v8 }
  0x7f   : > { %vm1285_vm12 = vmand (!%p732_p0), %vm337_vm7, %vm341_vm0  ;;  %v361_v17 = vsel (!%p732_p0), %vm346_vm11, %v330_v6, 0.0  ;;  %v397_v18 = vsel (!%p732_p0), %vm346_vm11, 1.0, %v1046_v8  ;;  %vm424_vm0 = vcmask (!%p732_p0), 1040384   ;;  %vm428_vm2 = vcmask (!%p732_p0), 1042432  }
  0x80   : > { %vm348_vm13 = vmand %vm338_vm9, %vm342_vm5  ;;  %v354_v19 = vrot.slane %v353_v12, 4  ;;  %v362_v20 = vadd.f32 %v361_v17, %v360_v13  ;;  %v369_v21 = vsel %vm1285_vm12, %v329_v1, 0.0  ;;  %v390_v22 = vrot.slane %v389_v14, 4 }
  0x81   : > { %vm1295_vm14 = vmand %vm337_vm7, %vm339_vm3  ;;  %v370_v24 = vsel %vm348_vm13, %v330_v6, 0.0  ;;  %v398_v25 = vadd.f32 %v397_v18, %v396_v15  ;;  %v405_v26 = vsel %vm1285_vm12, 1.0, %v1046_v8  ;;  %v406_v27 = vsel %vm348_vm13, 1.0, %v1046_v8 }
  0x82   : > { %vm1303_vm15 = vmand %vm338_vm9, %vm340_vm4  ;;  %v355_v29 = vadd.f32 %v354_v19, %v353_v12  ;;  %v363_v30 = vrot.slane %v362_v20, 4  ;;  %v371_v31 = vadd.f32 %v370_v24, %v369_v21  ;;  %v378_v32 = vsel %vm1295_vm14, %v329_v1, 0.0  ;;  %v423_v24 = vld [vmem:[#allocation2] sm:$0xff] }
  0x83   : > { %v379_v33 = vsel %vm1303_vm15, %v330_v6, 0.0  ;;  %v391_v34 = vadd.f32 %v390_v22, %v389_v14  ;;  %v399_v35 = vrot.slane %v398_v25, 4  ;;  %v407_v36 = vadd.f32 %v406_v27, %v405_v26 }
  0x84   : > { %v356_v37 = vrot.slane %v355_v29, 2  ;;  %v364_v38 = vadd.f32 %v363_v30, %v362_v20  ;;  %v372_v39 = vrot.slane %v371_v31, 4  ;;  %v380_v40 = vadd.f32 %v379_v33, %v378_v32 }
  0x85   : > { %v392_v41 = vrot.slane %v391_v34, 2  ;;  %v400_v42 = vadd.f32 %v399_v35, %v398_v25  ;;  %v408_v43 = vrot.slane %v407_v36, 4  ;;  %v414_v44 = vsel %vm1295_vm14, 1.0, %v1046_v8 }
  0x86   : > { %v357_v45 = vadd.f32 %v356_v37, %v355_v29  ;;  %v365_v46 = vrot.slane %v364_v38, 2  ;;  %v373_v47 = vadd.f32 %v372_v39, %v371_v31  ;;  %v381_v48 = vrot.slane %v380_v40, 4 }
  0x87   : > { %v393_v49 = vadd.f32 %v392_v41, %v391_v34  ;;  %v401_v50 = vrot.slane %v400_v42, 2  ;;  %v409_v51 = vadd.f32 %v408_v43, %v407_v36  ;;  %v415_v52 = vsel %vm1303_vm15, 1.0, %v1046_v8 }
  0x88   : > { %v358_v53 = vrot.slane %v357_v45, 1  ;;  %v366_v54 = vadd.f32 %v365_v46, %v364_v38  ;;  %v374_v55 = vrot.slane %v373_v47, 2  ;;  %v382_v56 = vadd.f32 %v381_v48, %v380_v40 }
  0x89   : > { %v402_v57 = vadd.f32 %v401_v50, %v400_v42  ;;  %v410_v58 = vrot.slane %v409_v51, 2  ;;  %v416_v59 = vadd.f32 %v415_v52, %v414_v44  ;;  %v394_v0 = vrot.slane %v393_v49, 1 }
  0x8a   : > { %v359_v60 = vadd.f32 %v358_v53, %v357_v45  ;;  %v367_v61 = vrot.slane %v366_v54, 1  ;;  %v375_v62 = vadd.f32 %v374_v55, %v373_v47  ;;  %v383_v63 = vrot.slane %v382_v56, 2 }
  0x8b   : > { %v411_v1 = vadd.f32 %v410_v58, %v409_v51  ;;  %v417_v2 = vrot.slane %v416_v59, 4  ;;  %v403_v6 = vrot.slane %v402_v57, 1  ;;  %v395_v12 = vadd.f32 %v394_v0, %v393_v49 }
  0x8c   : > { %v368_v3 = vadd.f32 %v367_v61, %v366_v54  ;;  %v376_v4 = vrot.slane %v375_v62, 1  ;;  %v384_v5 = vadd.f32 %v383_v63, %v382_v56  ;;  %vm430_vm3 = vcmask 1043456  }
  0x8d   : > { %v412_v7 = vrot.slane %v411_v1, 1  ;;  %v418_v8 = vadd.f32 %v417_v2, %v416_v59  ;;  %v404_v15 = vadd.f32 %v403_v6, %v402_v57  ;;  %vm432_vm4 = vcmask 1044480  }
  0x8e   : > { %v377_v9 = vadd.f32 %v376_v4, %v375_v62  ;;  %v385_v10 = vrot.slane %v384_v5, 1  ;;  %v425_v11 = vsel %vm424_vm0, %v359_v60, %v368_v3  ;;  %vm434_vm5 = vcmask 1045504  }
  0x8f   : > { %v419_v13 = vrot.slane %v418_v8, 2  ;;  %v413_v17 = vadd.f32 %v412_v7, %v411_v1 }
  0x90   : > { %v386_v14 = vadd.f32 %v385_v10, %v384_v5  ;;  %v427_v16 = vsel %vm426_vm1, %v425_v11, %v377_v9 }
  0x91   : > { %v420_v18 = vadd.f32 %v419_v13, %v418_v8 }
  0x92   : > { %v429_v19 = vsel %vm428_vm2, %v427_v16, %v386_v14 }
  0x93   : > { %v421_v20 = vrot.slane %v420_v18, 1  ;;  %v431_v21 = vsel %vm430_vm3, %v429_v19, %v395_v12 }
  0x94   : > { %v433_v22 = vsel %vm432_vm4, %v431_v21, %v404_v15 }
  0x95   : > { %v422_v23 = vadd.f32 %v421_v20, %v420_v18  ;;  %v435_v25 = vsel %vm434_vm5, %v433_v22, %v413_v17 }
  0x97   : > { %v437_v26 = vsel %vm436_vm6, %v435_v25, %v422_v23 }
  0x98   : > { %v438_v27 = vadd.f32 %v437_v26, %v423_v24 }
  0x9a   : > { %439 = vst [vmem:[#allocation2] sm:$0xff] %v438_v27 }
  0x9b PF: > { %p441_p9 = scmp.gt.s32.totalorder %s1265_s20, 0 }
  0x9d   : > { %p442_p10 = pnand %p732_p0, %p441_p9 }
  0x9e   : > { %v446_v28 = vlaneseq (!%p442_p10)  ;;  %v462_v31 = vld [vmem:[%s1267_s26] sm:$0xff] (!%p442_p10)  ;;  %v455_v34 = vstv (!%p442_p10), %s1265_s20  ;;  %v463_v35 = vld [vmem:[%s1267_s26 + $0x8] sm:$0xff] (!%p442_p10)  ;;  %v1047_v47 = vmov (!%p442_p10), 0.0  }
  0x9f   : > { %445 = sbr.rel (%p442_p10) target bundleno = 203 (0xcb), region = 56  ;;  %vm464_vm7 = vcmp.eq.f32.partialorder (!%p442_p10), %v462_v31, 1.0  ;;  %v460_v38 = vld [vmem:[%s1253_s7] sm:$0xff] (!%p442_p10)  ;;  %vm466_vm8 = vcmp.eq.f32.partialorder (!%p442_p10), %v462_v31, 0.0  ;;  %v461_v40 = vld [vmem:[%s1253_s7 + $0x8] sm:$0xff] (!%p442_p10)  ;;  %vm465_vm10 = vcmp.eq.f32.partialorder (!%p442_p10), %v463_v35, 1.0 }
  0xa0   : > { %v447_v29 = vshrl.u32 (!%p442_p10), %v446_v28, 7  ;;  %v450_v30 = vand.u32 (!%p442_p10), 127, %v446_v28  ;;  %vm467_vm11 = vcmp.eq.f32.partialorder (!%p442_p10), %v463_v35, 0.0  ;;  %vm474_vm15 = vcmp.eq.f32.partialorder (!%p442_p10), %v460_v38, 0.0  ;;  %v458_v43 = vld [vmem:[%s1246_s4] sm:$0xff] (!%p442_p10)  ;;  %v459_v44 = vld [vmem:[%s1246_s4 + $0x8] sm:$0xff] (!%p442_p10) }
  0xa1   : > { %vm475_vm1 = vcmp.eq.f32.partialorder (!%p442_p10), %v461_v40, 0.0  ;;  %vm472_vm3 = vcmp.eq.f32.partialorder (!%p442_p10), %v460_v38, 1.0  ;;  %vm473_vm4 = vcmp.eq.f32.partialorder (!%p442_p10), %v461_v40, 1.0 }
  0xa2   : > { %v448_v32 = vadd.s32 (!%p442_p10), 8, %v447_v29  ;;  %v451_v33 = vmul.u32 (!%p442_p10), 128, %v447_v29 }
  0xa4   : > { %v452_v36 = vmul.u32 (!%p442_p10), 128, %v448_v32  ;;  %v453_v37 = vadd.s32 (!%p442_p10), %v451_v33, %v450_v30 }
  0xa6   : > { %v454_v39 = vadd.s32 %v452_v36, %v450_v30  ;;  %vm456_vm9 = vcmp.lt.s32.totalorder %v453_v37, %v455_v34 }
  0xa7   : > { %vm1323_vm12 = vmand %vm464_vm7, %vm456_vm9 }
  0xa8   : > { %vm457_vm13 = vcmp.lt.s32.totalorder %v454_v39, %v455_v34  ;;  %vm1327_vm14 = vmand %vm466_vm8, %vm456_vm9 }
  0xa9   : > { %vm469_vm0 = vmand %vm465_vm10, %vm457_vm13 }
  0xaa   : > { %vm1333_vm2 = vmand %vm467_vm11, %vm457_vm13  ;;  %vm557_vm13 = vcmask 1040384  }
  0xab   : > { %vm476_vm5 = vmand %vm1323_vm12, %vm474_vm15 }
  0xac   : > { %vm477_vm6 = vmand %vm469_vm0, %vm475_vm1  ;;  %v484_v46 = vsel %vm476_vm5, %v458_v43, 0.0  ;;  %v520_v48 = vsel %vm476_vm5, 1.0, %v1047_v47 }
  0xad   : > { %vm478_vm7 = vmand %vm1323_vm12, %vm472_vm3  ;;  %v485_v49 = vsel %vm477_vm6, %v459_v44, 0.0  ;;  %v521_v50 = vsel %vm477_vm6, 1.0, %v1047_v47 }
  0xae   : > { %vm479_vm8 = vmand %vm469_vm0, %vm473_vm4  ;;  %v486_v51 = vadd.f32 %v485_v49, %v484_v46  ;;  %v493_v52 = vsel %vm478_vm7, %v458_v43, 0.0  ;;  %v522_v53 = vadd.f32 %v521_v50, %v520_v48  ;;  %v529_v54 = vsel %vm478_vm7, 1.0, %v1047_v47 }
  0xaf   : > { %vm1348_vm9 = vmand %vm1327_vm14, %vm474_vm15  ;;  %v494_v56 = vsel %vm479_vm8, %v459_v44, 0.0  ;;  %v530_v57 = vsel %vm479_vm8, 1.0, %v1047_v47  ;;  %vm561_vm15 = vcmask 1042432   ;;  %vm563_vm0 = vcmask 1043456  }
  0xb0   : > { %vm481_vm10 = vmand %vm1333_vm2, %vm475_vm1  ;;  %v487_v58 = vrot.slane %v486_v51, 4  ;;  %v495_v59 = vadd.f32 %v494_v56, %v493_v52  ;;  %v502_v60 = vsel %vm1348_vm9, %v458_v43, 0.0  ;;  %v523_v61 = vrot.slane %v522_v53, 4 }
  0xb1   : > { %vm1360_vm11 = vmand %vm1327_vm14, %vm472_vm3  ;;  %v503_v63 = vsel %vm481_vm10, %v459_v44, 0.0  ;;  %v531_v0 = vadd.f32 %v530_v57, %v529_v54  ;;  %v538_v1 = vsel %vm1348_vm9, 1.0, %v1047_v47  ;;  %v539_v2 = vsel %vm481_vm10, 1.0, %v1047_v47 }
  0xb2   : > { %vm1369_vm12 = vmand %vm1333_vm2, %vm473_vm4  ;;  %v488_v4 = vadd.f32 %v487_v58, %v486_v51  ;;  %v496_v5 = vrot.slane %v495_v59, 4  ;;  %v504_v6 = vadd.f32 %v503_v63, %v502_v60  ;;  %v511_v7 = vsel %vm1360_vm11, %v458_v43, 0.0  ;;  %v556_v63 = vld [vmem:[#allocation2] sm:$0xff] }
  0xb3   : > { %v512_v8 = vsel %vm1369_vm12, %v459_v44, 0.0  ;;  %v524_v9 = vadd.f32 %v523_v61, %v522_v53  ;;  %v532_v10 = vrot.slane %v531_v0, 4  ;;  %v540_v11 = vadd.f32 %v539_v2, %v538_v1 }
  0xb4   : > { %v489_v12 = vrot.slane %v488_v4, 2  ;;  %v497_v13 = vadd.f32 %v496_v5, %v495_v59  ;;  %v505_v14 = vrot.slane %v504_v6, 4  ;;  %v513_v15 = vadd.f32 %v512_v8, %v511_v7 }
  0xb5   : > { %v525_v16 = vrot.slane %v524_v9, 2  ;;  %v533_v17 = vadd.f32 %v532_v10, %v531_v0  ;;  %v541_v18 = vrot.slane %v540_v11, 4  ;;  %v547_v19 = vsel %vm1360_vm11, 1.0, %v1047_v47 }
  0xb6   : > { %v490_v20 = vadd.f32 %v489_v12, %v488_v4  ;;  %v498_v21 = vrot.slane %v497_v13, 2  ;;  %v506_v22 = vadd.f32 %v505_v14, %v504_v6  ;;  %v514_v23 = vrot.slane %v513_v15, 4 }
  0xb7   : > { %v526_v24 = vadd.f32 %v525_v16, %v524_v9  ;;  %v534_v25 = vrot.slane %v533_v17, 2  ;;  %v542_v26 = vadd.f32 %v541_v18, %v540_v11  ;;  %v548_v27 = vsel %vm1369_vm12, 1.0, %v1047_v47 }
  0xb8   : > { %v491_v28 = vrot.slane %v490_v20, 1  ;;  %v499_v29 = vadd.f32 %v498_v21, %v497_v13  ;;  %v507_v30 = vrot.slane %v506_v22, 2  ;;  %v515_v31 = vadd.f32 %v514_v23, %v513_v15 }
  0xb9   : > { %v535_v32 = vadd.f32 %v534_v25, %v533_v17  ;;  %v543_v33 = vrot.slane %v542_v26, 2  ;;  %v549_v34 = vadd.f32 %v548_v27, %v547_v19  ;;  %v527_v39 = vrot.slane %v526_v24, 1 }
  0xba   : > { %v492_v35 = vadd.f32 %v491_v28, %v490_v20  ;;  %v500_v36 = vrot.slane %v499_v29, 1  ;;  %v508_v37 = vadd.f32 %v507_v30, %v506_v22  ;;  %v516_v38 = vrot.slane %v515_v31, 2 }
  0xbb   : > { %v544_v40 = vadd.f32 %v543_v33, %v542_v26  ;;  %v550_v41 = vrot.slane %v549_v34, 4  ;;  %v536_v45 = vrot.slane %v535_v32, 1  ;;  %vm559_vm14 = vcmask 1041408  }
  0xbc   : > { %v501_v42 = vadd.f32 %v500_v36, %v499_v29  ;;  %v509_v43 = vrot.slane %v508_v37, 1  ;;  %v517_v44 = vadd.f32 %v516_v38, %v515_v31  ;;  %v528_v51 = vadd.f32 %v527_v39, %v526_v24 }
  0xbd   : > { %v545_v46 = vrot.slane %v544_v40, 1  ;;  %v551_v47 = vadd.f32 %v550_v41, %v549_v34  ;;  %v537_v54 = vadd.f32 %v536_v45, %v535_v32  ;;  %vm565_vm1 = vcmask 1044480  }
  0xbe   : > { %v510_v48 = vadd.f32 %v509_v43, %v508_v37  ;;  %v518_v49 = vrot.slane %v517_v44, 1  ;;  %v558_v50 = vsel %vm557_vm13, %v492_v35, %v501_v42  ;;  %vm567_vm2 = vcmask 1045504  }
  0xbf   : > { %v552_v52 = vrot.slane %v551_v47, 2  ;;  %v546_v56 = vadd.f32 %v545_v46, %v544_v40  ;;  %vm569_vm3 = vcmask 1046528  }
  0xc0   : > { %v519_v53 = vadd.f32 %v518_v49, %v517_v44  ;;  %v560_v55 = vsel %vm559_vm14, %v558_v50, %v510_v48 }
  0xc1   : > { %v553_v57 = vadd.f32 %v552_v52, %v551_v47 }
  0xc2   : > { %v562_v58 = vsel %vm561_vm15, %v560_v55, %v519_v53 }
  0xc3   : > { %v554_v59 = vrot.slane %v553_v57, 1  ;;  %v564_v60 = vsel %vm563_vm0, %v562_v58, %v528_v51 }
  0xc4   : > { %v566_v61 = vsel %vm565_vm1, %v564_v60, %v537_v54 }
  0xc5   : > { %v555_v62 = vadd.f32 %v554_v59, %v553_v57  ;;  %v568_v0 = vsel %vm567_vm2, %v566_v61, %v546_v56 }
  0xc7   : > { %v570_v1 = vsel %vm569_vm3, %v568_v0, %v555_v62 }
  0xc8   : > { %v571_v2 = vadd.f32 %v570_v1, %v556_v63 }
  0xca   : > { %572 = vst [vmem:[#allocation2] sm:$0xff] %v571_v2 }
  0xcb PF: > { %s734_s24 = sshll.u32 %s1030_s17, 7  ;;  %s592_s18 = sshll.u32 %s304_s9, 4  ;;  %s593_s18 = int_to_ptr.vmem [resolvable:$true] %s592_s18 }
  0xcc   : > { %s1387_s23 = scalar_lea.hbm %s1441_s3, %s734_s24  ;;  %s579_s1 = scalar_lea.sflag [#allocation5], %s302_s5 }
  0xcd   : > { %s931_s27 = scalar_lea.vmem %s593_s18, 128  ;;  %p1483_p1 = scmp.ne.s32.totalorder %s1454_s28, 0 }
  0xce   : > { %p932_p11 = scmp.ne.s32.totalorder %s593_s18, %s931_s27  ;;  %s1048_s21 = smov [#allocation9]  }
  0xcf   : > { %s935_s22 = sshll.u32 %s1048_s21, 4  ;;  %s936_s22 = int_to_ptr.vmem [resolvable:$false] %s935_s22 }
  0xd0   : > { %p933_p4 = pnand %p932_p11, %p1483_p1  ;;  %s937_s17 = scalar_lea.vmem %s936_s22, 256 }
  0xd1   : > { %v576_v3 = vld [vmem:[#allocation2] sm:$0xff]  ;;  %p938_p13 = scmp.lt.s32.totalorder %s593_s18, %s936_s22  ;;  %p939_p3 = scmp.lt.s32.totalorder %s937_s17, %s931_s27 }
  0xd2   : > { %577 = vst [vmem:[%s304_s9] sm:$0xff] %v576_v3  ;;  %p934_p7 = pneg %p933_p4 }
  0xd3   : > { %p940_p6 = por %p939_p3, %p938_p13 }
  0xd5   : > { %p941_p2 = pnand %p940_p6, %p934_p7 }
  0xd7   : > { %944 = shalt.err (!%p941_p2)
}
  0xd8   : > { %s945_s25 = scalar_lea.hbm %s1387_s23, 128  ;;  %s949_s6 = scalar_lea.hbm %s1441_s3, 256 }
  0xd9   : > { %p946_p12 = scmp.ne.s32.totalorder %s1387_s23, %s945_s25  ;;  %p950_p0 = scmp.lt.u32.totalorder %s1387_s23, %s1441_s3 }
  0xda   : > { %p951_p9 = scmp.lt.u32.totalorder %s949_s6, %s945_s25  ;;  %p953_p11 = scmp.lt.u32.totalorder %s945_s25, %s1387_s23 }
  0xdb   : > { %p947_p8 = pnand %p946_p12, %p1483_p1 }
  0xdc   : > { %p952_p10 = por %p951_p9, %p950_p0 }
  0xdd   : > { %p948_p5 = pneg %p947_p8 }
  0xde   : > { %p954_p4 = por %p953_p11, %p952_p10 }
  0xe0   : > { %p955_p7 = pnand %p954_p4, %p948_p5 }
  0xe2   : > { %958 = shalt.err (!%p955_p7)
}
  0xe3   : > { %746 = dma.vmem_to_hbm [thread:$0]  (%p1483_p1), %s593_s18, 128, %s1387_s23, %s579_s1  }
  0xe4 PF: > { %s604_s8 = sand.u32 1, %s1010_s12   ;;  %p1484_p13 = scmp.ne.s32.totalorder %s1455_s29, 0 }
  0xe5   : > { %p1485_p3 = scmp.ge.s32.totalorder %s1038_s19, 2  ;;  %s605_s11 = scalar_lea.sflag [#allocation5], %s604_s8 }
  0xe7   : > { %p759_p6 = pnand %p1485_p3, %p1484_p13 }
  0xe9   : > { %1004 = dma.done.wait (!%p759_p6), %s605_s11, 128  }
  0xea   : > { %1006 = vsyncadd (!%p759_p6), %s605_s11, 4294967168  ;;  %s22_s19 = sadd.s32 1, %s1038_s19   ;;  %s1486_s20 = sld [smem:[#allocation15_spill]] }
  0xeb   : > { %p19_p2 = scmp.ge.s32.totalorder %s22_s19, 4   ;;  %s1487_s17 = sld [smem:[#allocation13_spill]] }
  0xec   : > { %s1488_s18 = sld [smem:[#allocation14_spill]]  ;;  %s1489_s12 = smov %s1014_s13 }
  0xed   : > { %s1490_s13 = smov %s1018_s14  ;;  %s1492_s15 = smov %s1026_s16 }
  0xee   : > { %s1428_s16 = smov 0   ;;  %21 = sbr.rel (!%p19_p2) target bundleno = 11 (0xb), region = 117 }
  0xf0   : > { %s1491_s14 = smov %s1486_s20 }
  0xf5   :  { %610 = vsyncpa [#allocation4], 1 }
  0xf6   :  { %612 = vsyncpa [#allocation4 + $0x1], 1 }
  0xf7   :  { %613 = vsyncpa [#allocation7], 1 }
  0xf8   :  { %615 = vsyncpa [#allocation7 + $0x1], 1 }
  0xf9   :  { %616 = vsyncpa [#allocation5], 1 }
  0xfa   :  { %618 = vsyncpa [#allocation5 + $0x1], 1 }

</bundles_post_ra>
